<compile_context>
chip_gen: v7x
topology: tpu7x:2x2x1
jax: 0.10.0
libtpu: 0.0.40
codegen_flags: <defaults>
</compile_context>

<pallas_src>
import functools

import jax
import jax.numpy as jnp
from jax.experimental import pallas as pl
from jax.experimental.pallas import tpu as pltpu

_LANE = 1024                       # lane-dense tile width (multiple of 128)
_VMEM_BUDGET = 24 * 1024 * 1024    # target double-buffered block footprint


def _round_up(x: int, m: int) -> int:
    return ((x + m - 1) // m) * m


def _convert_kernel(x_ref, o_ref, *, scale):
    if scale is None:
        # float -> float: plain cast, no multiply, no f32 widening.
        o_ref[...] = x_ref[...].astype(o_ref.dtype)
    else:
        x = x_ref[...].astype(jnp.float32)
        o_ref[...] = (x * jnp.float32(scale)).astype(o_ref.dtype)


def _dtype_max(dt) -> float:
    dt = jnp.dtype(dt)
    if jnp.issubdtype(dt, jnp.integer):
        return float(jnp.iinfo(dt).max)
    return 1.0


def convert_image_dtype(image: jax.Array, dtype) -> jax.Array:
    """Pallas implementation of torchvision F.convert_image_dtype."""
    in_dt = jnp.dtype(image.dtype)
    out_dt = jnp.dtype(dtype)

    if in_dt == out_dt:
        return image

    in_is_float = jnp.issubdtype(in_dt, jnp.floating)
    out_is_float = jnp.issubdtype(out_dt, jnp.floating)

    if in_is_float and out_is_float:
        scale = None                              # plain cast
    elif (not in_is_float) and out_is_float:
        scale = 1.0 / _dtype_max(in_dt)
    elif in_is_float and (not out_is_float):
        eps = 1e-3
        scale = _dtype_max(out_dt) + 1.0 - eps
    else:
        # TODO(synk): int->int conversion (bit-shift rescale) not implemented.
        raise NotImplementedError("int -> int conversion not supported")

    orig_shape = image.shape
    total = 1
    for d in orig_shape:
        total *= int(d)

    # Sublane packing requirement for both the (narrow) input and the output.
    sub = max(32 // in_dt.itemsize, 32 // out_dt.itemsize, 8)

    rows_total = pl.cdiv(total, _LANE)

    # Size blocks so double-buffered (input + output) stays within budget.
    bytes_per_elem = in_dt.itemsize + out_dt.itemsize
    block_elems = _VMEM_BUDGET // (2 * bytes_per_elem)
    rows_block = max(sub, (block_elems // _LANE) // sub * sub)
    rows_block = min(rows_block, _round_up(rows_total, sub))

    # Prefer >= 2 grid steps when the data allows (v7x: 2 TensorCores/chip).
    if rows_total > sub and _round_up(rows_total, rows_block) // rows_block < 2:
        rows_block = max(sub, _round_up(pl.cdiv(rows_block, 2), sub))

    rows_padded = _round_up(rows_total, rows_block)
    grid = (rows_padded // rows_block,)

    # Flatten, pad to a whole number of blocks, reshape lane-dense.
    flat = image.reshape(-1)
    pad = rows_padded * _LANE - total
    if pad:
        flat = jnp.pad(flat, (0, pad))
    x2d = flat.reshape(rows_padded, _LANE)

    kernel = functools.partial(_convert_kernel, scale=scale)

    out2d = pl.pallas_call(
        kernel,
        out_shape=jax.ShapeDtypeStruct((rows_padded, _LANE), out_dt),
        grid_spec=pltpu.PrefetchScalarGridSpec(
            num_scalar_prefetch=0,
            grid=grid,
            in_specs=[pl.BlockSpec((rows_block, _LANE), lambda i: (i, 0))],
            out_specs=pl.BlockSpec((rows_block, _LANE), lambda i: (i, 0)),
        ),
        compiler_params=pltpu.CompilerParams(
            dimension_semantics=("parallel",),
            vmem_limit_bytes=32 * 1024 * 1024,
        ),
    )(x2d)

    out_flat = out2d.reshape(-1)
    if pad:
        out_flat = out_flat[:total]
    return out_flat.reshape(orig_shape)


class ConvertImageDtype:
    """Mirror of the PyTorch module: returns (converted_image, target)."""

    def __init__(self, dtype):
        self.dtype = dtype

    def __call__(self, image, target=None):
        return convert_image_dtype(image, self.dtype), target


if __name__ == "__main__":
    key = jax.random.PRNGKey(0)
    # uint8 image, NCHW, small shape.
    x_u8 = jax.random.randint(
        key, (2, 4, 16, 16), minval=0, maxval=256, dtype=jnp.int32
    ).astype(jnp.uint8)

    module = ConvertImageDtype(jnp.float32)
    out, tgt = module(x_u8, target=None)
    out = jax.block_until_ready(out)

    # Reference: int -> float is x / max(uint8) = x / 255.
    ref = x_u8.astype(jnp.float32) / 255.0
    assert out.dtype == jnp.float32
    assert out.shape == x_u8.shape
    assert jnp.allclose(out, ref, atol=1e-6), "mismatch vs reference"
    assert tgt is None

    # Also exercise the float->float (plain-cast) and float->int paths.
    x_f32 = ref
    out_bf16, _ = ConvertImageDtype(jnp.bfloat16)(x_f32)
    out_bf16 = jax.block_until_ready(out_bf16)
    assert out_bf16.dtype == jnp.bfloat16
    assert jnp.allclose(
        out_bf16.astype(jnp.float32), x_f32.astype(jnp.bfloat16).astype(jnp.float32)
    )

    out_u8, _ = ConvertImageDtype(jnp.uint8)(x_f32)
    out_u8 = jax.block_until_ready(out_u8)
    ref_u8 = (x_f32 * (255.0 + 1.0 - 1e-3)).astype(jnp.uint8)
    assert out_u8.dtype == jnp.uint8
    assert jnp.array_equal(out_u8, ref_u8)

    print("KERNEL_OK")
</pallas_src>

<mosaic_0001>
module attributes {stable_mosaic.version = 11 : i64} {
  func.func @_convert_kernel(%arg0: i32, %arg1: memref<32x1024xi8, #tpu.memory_space<vmem>>, %arg2: memref<32x1024xf32, #tpu.memory_space<vmem>>) attributes {dimension_semantics = [#tpu.dimension_semantics<parallel>], iteration_bounds = array<i64: 1>, scalar_prefetch = 0 : i64, scratch_operands = 0 : i64, tpu.core_type = #tpu.core_type<tc>, window_params = [{transform_indices = @transform_0, window_bounds = array<i64: 32, 1024>}, {transform_indices = @transform_1, window_bounds = array<i64: 32, 1024>}]} {
    %c0 = arith.constant 0 : index
    %c0_0 = arith.constant 0 : index
    %0 = vector.load %arg1[%c0, %c0_0] : memref<32x1024xi8, #tpu.memory_space<vmem>>, vector<32x1024xi8>
    %1 = arith.uitofp %0 : vector<32x1024xi8> to vector<32x1024xf32>
    %cst = arith.constant 0.00392156886 : f32
    %2 = vector.broadcast %cst : f32 to vector<32x1024xf32>
    %3 = arith.mulf %1, %2 : vector<32x1024xf32>
    %c0_1 = arith.constant 0 : index
    %c0_2 = arith.constant 0 : index
    %4 = vector.load %arg2[%c0_1, %c0_2] : memref<32x1024xf32, #tpu.memory_space<vmem>>, vector<32x1024xf32>
    tpu.vector_store %arg2[%c0_1, %c0_2], %3 {strides = array<i32>} : memref<32x1024xf32, #tpu.memory_space<vmem>>, vector<32x1024xf32>,
    return
  }
  func.func @transform_0(%arg0: i32) -> (i32, i32) {
    %c0_i32 = arith.constant 0 : i32
    %c0_i32_0 = arith.constant 0 : i32
    return %arg0, %c0_i32 : i32, i32
  }
  func.func @transform_1(%arg0: i32) -> (i32, i32) {
    %c0_i32 = arith.constant 0 : i32
    %c0_i32_0 = arith.constant 0 : i32
    return %arg0, %c0_i32 : i32, i32
  }
}

</mosaic_0001>

<bundles_post_ra>
// kernel: tpu_custom_call.1
= control target key start
LH: loop header
LB: loop body
LE: loop exit
PB: predicated region body
PF: predicated region fallthrough
CT: control target
= control target key end

     0   :  { %6 = vsyncpa [#allocation3], 0  ;;  %s344_s0 = inlined_call_operand.hbm [shape: u8[32,1024], index: 0, kind: input, shape index: {}]   ;;  %s345_s1 = inlined_call_operand.hbm [shape: f32[32,1024], index: 1, kind: output, shape index: {}]  }
   0x1   :  { %7 = vsyncpa [#allocation4], 0  ;;  %s258_s6 = smov [#allocation2]   ;;  %s210_s10 = scalar_lea.hbm %s344_s0, 1024 }
   0x2   :  { %s14_s7 = sshll.u32 %s258_s6, 4  ;;  %p211_p0 = scmp.ne.s32.totalorder %s344_s0, %s210_s10  ;;  %s15_s7 = int_to_ptr.vmem [resolvable:$true] %s14_s7 }
   0x3   :  { %p214_p1 = scmp.lt.u32.totalorder %s210_s10, %s344_s0 }
   0x5   :  { %p216_p2 = pnand %p214_p1, %p211_p0 }
   0x7   :  { %219 = shalt.err (!%p216_p2)
}
   0x8   :  { %s220_s15 = scalar_lea.vmem %s15_s7, 1024  ;;  %p225_p4 = scmp.lt.s32.totalorder %s15_s7, %s15_s7 }
   0x9   :  { %p221_p3 = scmp.ne.s32.totalorder %s15_s7, %s220_s15  ;;  %p226_p5 = scmp.lt.s32.totalorder %s220_s15, %s220_s15 }
   0xb   :  { %p227_p6 = por %p226_p5, %p225_p4 }
   0xd   :  { %p228_p7 = pnand %p227_p6, %p221_p3 }
   0xf   :  { %231 = shalt.err (!%p228_p7)
}
  0x10   :  { %17 = dma.hbm_to_vmem [thread:$0]  %s344_s0, 1024, %s15_s7, [#allocation3]  }
  0x11   :  { %254 = dma.done.wait [#allocation3], 1024  }
  0x12   :  { %255 = vsyncadd [#allocation3], 4294966272  ;;  %v284_v0 = vld [vmem:[#allocation2] sm:$0xff]  ;;  %v286_v1 = vld [vmem:[#allocation2 + $0x8] sm:$0xff]  ;;  %s259_s0 = smov [#allocation5]  }
  0x13   :  { %v288_v2 = vld [vmem:[#allocation2 + $0x10] sm:$0xff]  ;;  %v29_v3 = vunpack.c.0.s8 %v284_v0  ;;  %v30_v4 = vunpack.c.0.s8 %v286_v1  ;;  %v293_v6 = vld [vmem:[#allocation2 + $0x18] sm:$0xff]  ;;  %v295_v7 = vld [vmem:[#allocation2 + $0x20] sm:$0xff]  ;;  %v37_v9 = vunpack.c.1.s8 %v284_v0  ;;  %v38_v15 = vunpack.c.1.s8 %v286_v1  ;;  %s194_s18 = sshll.u32 %s259_s0, 4  ;;  %s195_s18 = int_to_ptr.vmem [resolvable:$true] %s194_s18 }
  0x14   :  { %v31_v5 = vunpack.c.0.s8 %v288_v2  ;;  %v297_v8 = vld [vmem:[#allocation2 + $0x28] sm:$0xff]  ;;  %v32_v10 = vunpack.c.0.s8 %v293_v6  ;;  %v33_v11 = vunpack.c.0.s8 %v295_v7  ;;  %v303_v13 = vld [vmem:[#allocation2 + $0x30] sm:$0xff]  ;;  %v305_v14 = vld [vmem:[#allocation2 + $0x38] sm:$0xff]  ;;  %v39_v43 = vunpack.c.1.s8 %v288_v2  ;;  %s232_s19 = scalar_lea.vmem %s195_s18, 4096  ;;  %p237_p9 = scmp.lt.s32.totalorder %s195_s18, %s195_s18 }
  0x15   :  { %v34_v12 = vunpack.c.0.s8 %v297_v8  ;;  %v61_v16 = vand.u32 255, %v29_v3  ;;  %v62_v17 = vand.u32 255, %v30_v4  ;;  %v35_v19 = vunpack.c.0.s8 %v303_v13  ;;  %p233_p8 = scmp.ne.s32.totalorder %s195_s18, %s232_s19  ;;  %p238_p10 = scmp.lt.s32.totalorder %s232_s19, %s232_s19 }
  0x16   :  { %v63_v18 = vand.u32 255, %v31_v5  ;;  %v64_v20 = vand.u32 255, %v32_v10  ;;  %v65_v21 = vand.u32 255, %v33_v11  ;;  %v36_v23 = vunpack.c.0.s8 %v305_v14 }
  0x17   :  { %v66_v22 = vand.u32 255, %v34_v12  ;;  %v93_v24 = vcvt.s32.f32 %v61_v16  ;;  %v94_v25 = vcvt.s32.f32 %v62_v17  ;;  %v67_v27 = vand.u32 255, %v35_v19  ;;  %p239_p11 = por %p238_p10, %p237_p9 }
  0x18   :  { %v95_v26 = vcvt.s32.f32 %v63_v18  ;;  %v96_v28 = vcvt.s32.f32 %v64_v20  ;;  %v97_v29 = vcvt.s32.f32 %v65_v21  ;;  %v68_v31 = vand.u32 255, %v36_v23 }
  0x19   :  { %v98_v30 = vcvt.s32.f32 %v66_v22  ;;  %v125_v32 = vmul.f32 0.003921569, %v93_v24  ;;  %v126_v33 = vmul.f32 0.003921569, %v94_v25  ;;  %v99_v35 = vcvt.s32.f32 %v67_v27  ;;  %p240_p12 = pnand %p239_p11, %p233_p8 }
  0x1a   :  { %v127_v34 = vmul.f32 0.003921569, %v95_v26  ;;  %v128_v36 = vmul.f32 0.003921569, %v96_v28  ;;  %v129_v37 = vmul.f32 0.003921569, %v97_v29  ;;  %v100_v39 = vcvt.s32.f32 %v68_v31 }
  0x1b   :  { %v130_v38 = vmul.f32 0.003921569, %v98_v30  ;;  %157 = vst [vmem:[#allocation5] sm:$0xff] %v125_v32  ;;  %158 = vst [vmem:[#allocation5 + $0x8] sm:$0xff] %v126_v33  ;;  %v131_v40 = vmul.f32 0.003921569, %v99_v35  ;;  %v40_v45 = vunpack.c.1.s8 %v293_v6  ;;  %v41_v46 = vunpack.c.1.s8 %v295_v7 }
  0x1c   :  { %159 = vst [vmem:[#allocation5 + $0x10] sm:$0xff] %v127_v34  ;;  %v69_v41 = vand.u32 255, %v37_v9  ;;  %v70_v42 = vand.u32 255, %v38_v15  ;;  %160 = vst [vmem:[#allocation5 + $0x18] sm:$0xff] %v128_v36  ;;  %v132_v44 = vmul.f32 0.003921569, %v100_v39  ;;  %v42_v47 = vunpack.c.1.s8 %v297_v8 }
  0x1d   :  { %161 = vst [vmem:[#allocation5 + $0x20] sm:$0xff] %v129_v37  ;;  %162 = vst [vmem:[#allocation5 + $0x28] sm:$0xff] %v130_v38  ;;  %v71_v50 = vand.u32 255, %v39_v43  ;;  %v43_v51 = vunpack.c.1.s8 %v303_v13  ;;  %v72_v52 = vand.u32 255, %v40_v45  ;;  %v73_v53 = vand.u32 255, %v41_v46 }
  0x1e   :  { %163 = vst [vmem:[#allocation5 + $0x30] sm:$0xff] %v131_v40  ;;  %v101_v48 = vcvt.s32.f32 %v69_v41  ;;  %v102_v49 = vcvt.s32.f32 %v70_v42  ;;  %164 = vst [vmem:[#allocation5 + $0x38] sm:$0xff] %v132_v44  ;;  %v74_v54 = vand.u32 255, %v42_v47  ;;  %v44_v55 = vunpack.c.1.s8 %v305_v14 }
  0x1f   :  { %v103_v58 = vcvt.s32.f32 %v71_v50  ;;  %v75_v59 = vand.u32 255, %v43_v51  ;;  %v104_v60 = vcvt.s32.f32 %v72_v52  ;;  %v105_v61 = vcvt.s32.f32 %v73_v53 }
  0x20   :  { %v133_v56 = vmul.f32 0.003921569, %v101_v48  ;;  %v134_v57 = vmul.f32 0.003921569, %v102_v49  ;;  %v106_v62 = vcvt.s32.f32 %v74_v54  ;;  %v76_v63 = vand.u32 255, %v44_v55 }
  0x21   :  { %v135_v3 = vmul.f32 0.003921569, %v103_v58  ;;  %v107_v4 = vcvt.s32.f32 %v75_v59  ;;  %v45_v5 = vunpack.c.2.s8 %v284_v0  ;;  %v46_v9 = vunpack.c.2.s8 %v286_v1 }
  0x22   :  { %165 = vst [vmem:[#allocation5 + $0x40] sm:$0xff] %v133_v56  ;;  %166 = vst [vmem:[#allocation5 + $0x48] sm:$0xff] %v134_v57  ;;  %v136_v10 = vmul.f32 0.003921569, %v104_v60  ;;  %v137_v11 = vmul.f32 0.003921569, %v105_v61  ;;  %v108_v15 = vcvt.s32.f32 %v76_v63  ;;  %v47_v19 = vunpack.c.2.s8 %v288_v2 }
  0x23   :  { %v138_v12 = vmul.f32 0.003921569, %v106_v62  ;;  %167 = vst [vmem:[#allocation5 + $0x50] sm:$0xff] %v135_v3  ;;  %v139_v16 = vmul.f32 0.003921569, %v107_v4  ;;  %v77_v17 = vand.u32 255, %v45_v5  ;;  %v48_v21 = vunpack.c.2.s8 %v293_v6 }
  0x24   :  { %v78_v18 = vand.u32 255, %v46_v9  ;;  %168 = vst [vmem:[#allocation5 + $0x58] sm:$0xff] %v136_v10  ;;  %169 = vst [vmem:[#allocation5 + $0x60] sm:$0xff] %v137_v11  ;;  %v140_v20 = vmul.f32 0.003921569, %v108_v15  ;;  %v49_v22 = vunpack.c.2.s8 %v295_v7  ;;  %v50_v23 = vunpack.c.2.s8 %v297_v8 }
  0x25   :  { %170 = vst [vmem:[#allocation5 + $0x68] sm:$0xff] %v138_v12  ;;  %171 = vst [vmem:[#allocation5 + $0x70] sm:$0xff] %v139_v16  ;;  %v109_v24 = vcvt.s32.f32 %v77_v17  ;;  %v79_v26 = vand.u32 255, %v47_v19  ;;  %v51_v27 = vunpack.c.2.s8 %v303_v13  ;;  %v80_v28 = vand.u32 255, %v48_v21 }
  0x26   :  { %v110_v25 = vcvt.s32.f32 %v78_v18  ;;  %172 = vst [vmem:[#allocation5 + $0x78] sm:$0xff] %v140_v20  ;;  %v81_v29 = vand.u32 255, %v49_v22  ;;  %v82_v30 = vand.u32 255, %v50_v23  ;;  %v52_v31 = vunpack.c.2.s8 %v305_v14 }
  0x27   :  { %v141_v32 = vmul.f32 0.003921569, %v109_v24  ;;  %v111_v34 = vcvt.s32.f32 %v79_v26  ;;  %v83_v35 = vand.u32 255, %v51_v27  ;;  %v112_v36 = vcvt.s32.f32 %v80_v28 }
  0x28   :  { %v142_v33 = vmul.f32 0.003921569, %v110_v25  ;;  %v113_v37 = vcvt.s32.f32 %v81_v29  ;;  %v114_v38 = vcvt.s32.f32 %v82_v30  ;;  %v84_v39 = vand.u32 255, %v52_v31 }
  0x29   :  { %173 = vst [vmem:[#allocation5 + $0x80] sm:$0xff] %v141_v32  ;;  %v143_v40 = vmul.f32 0.003921569, %v111_v34  ;;  %v115_v41 = vcvt.s32.f32 %v83_v35  ;;  %v53_v42 = vunpack.c.3.s8 %v284_v0  ;;  %v54_v43 = vunpack.c.3.s8 %v286_v1 }
  0x2a   :  { %174 = vst [vmem:[#allocation5 + $0x88] sm:$0xff] %v142_v33  ;;  %v144_v44 = vmul.f32 0.003921569, %v112_v36  ;;  %v145_v45 = vmul.f32 0.003921569, %v113_v37  ;;  %v116_v47 = vcvt.s32.f32 %v84_v39  ;;  %v55_v51 = vunpack.c.3.s8 %v288_v2 }
  0x2b   :  { %v146_v46 = vmul.f32 0.003921569, %v114_v38  ;;  %175 = vst [vmem:[#allocation5 + $0x90] sm:$0xff] %v143_v40  ;;  %v147_v48 = vmul.f32 0.003921569, %v115_v41  ;;  %v85_v49 = vand.u32 255, %v53_v42  ;;  %v56_v53 = vunpack.c.3.s8 %v293_v6 }
  0x2c   :  { %v86_v50 = vand.u32 255, %v54_v43  ;;  %176 = vst [vmem:[#allocation5 + $0x98] sm:$0xff] %v144_v44  ;;  %177 = vst [vmem:[#allocation5 + $0xa0] sm:$0xff] %v145_v45  ;;  %v148_v52 = vmul.f32 0.003921569, %v116_v47  ;;  %v57_v0 = vunpack.c.3.s8 %v295_v7  ;;  %v58_v1 = vunpack.c.3.s8 %v297_v8 }
  0x2d   :  { %178 = vst [vmem:[#allocation5 + $0xa8] sm:$0xff] %v146_v46  ;;  %179 = vst [vmem:[#allocation5 + $0xb0] sm:$0xff] %v147_v48  ;;  %v117_v54 = vcvt.s32.f32 %v85_v49  ;;  %v87_v56 = vand.u32 255, %v55_v51  ;;  %v59_v57 = vunpack.c.3.s8 %v303_v13  ;;  %v88_v58 = vand.u32 255, %v56_v53 }
  0x2e   :  { %v118_v55 = vcvt.s32.f32 %v86_v50  ;;  %180 = vst [vmem:[#allocation5 + $0xb8] sm:$0xff] %v148_v52  ;;  %v89_v59 = vand.u32 255, %v57_v0  ;;  %v90_v2 = vand.u32 255, %v58_v1  ;;  %v60_v60 = vunpack.c.3.s8 %v305_v14 }
  0x2f   :  { %v149_v61 = vmul.f32 0.003921569, %v117_v54  ;;  %v119_v63 = vcvt.s32.f32 %v87_v56  ;;  %v91_v6 = vand.u32 255, %v59_v57  ;;  %v120_v3 = vcvt.s32.f32 %v88_v58 }
  0x30   :  { %v150_v62 = vmul.f32 0.003921569, %v118_v55  ;;  %v121_v7 = vcvt.s32.f32 %v89_v59  ;;  %v122_v4 = vcvt.s32.f32 %v90_v2  ;;  %v92_v8 = vand.u32 255, %v60_v60 }
  0x31   :  { %181 = vst [vmem:[#allocation5 + $0xc0] sm:$0xff] %v149_v61  ;;  %v151_v5 = vmul.f32 0.003921569, %v119_v63  ;;  %v123_v9 = vcvt.s32.f32 %v91_v6  ;;  %v152_v13 = vmul.f32 0.003921569, %v120_v3 }
  0x32   :  { %182 = vst [vmem:[#allocation5 + $0xc8] sm:$0xff] %v150_v62  ;;  %v153_v10 = vmul.f32 0.003921569, %v121_v7  ;;  %v154_v11 = vmul.f32 0.003921569, %v122_v4  ;;  %v124_v12 = vcvt.s32.f32 %v92_v8 }
  0x33   :  { %183 = vst [vmem:[#allocation5 + $0xd0] sm:$0xff] %v151_v5  ;;  %v155_v14 = vmul.f32 0.003921569, %v123_v9  ;;  %184 = vst [vmem:[#allocation5 + $0xd8] sm:$0xff] %v152_v13 }
  0x34   :  { %185 = vst [vmem:[#allocation5 + $0xe0] sm:$0xff] %v153_v10  ;;  %186 = vst [vmem:[#allocation5 + $0xe8] sm:$0xff] %v154_v11  ;;  %v156_v15 = vmul.f32 0.003921569, %v124_v12 }
  0x35   :  { %187 = vst [vmem:[#allocation5 + $0xf0] sm:$0xff] %v155_v14 }
  0x36   :  { %188 = vst [vmem:[#allocation5 + $0xf8] sm:$0xff] %v156_v15 }
  0x37   :  { %243 = shalt.err (!%p240_p12)
}
  0x38   :  { %s244_s22 = scalar_lea.hbm %s345_s1, 4096 }
  0x39   :  { %p245_p13 = scmp.ne.s32.totalorder %s345_s1, %s244_s22  ;;  %p248_p0 = scmp.lt.u32.totalorder %s244_s22, %s345_s1 }
  0x3b   :  { %p250_p1 = pnand %p248_p0, %p245_p13 }
  0x3d   :  { %253 = shalt.err (!%p250_p1)
}
  0x3e   :  { %s260_s27 = smov 1024   ;;  %s261_s28 = smov 64  }
  0x3f   :  { %200 = dma.vmem_to_hbm [thread:$0]  %s195_s18, 4096, %s345_s1, [#allocation4], %s260_s27, %s260_s27, %s261_s28  }
  0x40   :  { %256 = dma.done.wait [#allocation4], 4096  }
  0x41   :  { %257 = vsyncadd [#allocation4], 4294963200 }
  0x42   :  { %204 = vsyncpa [#allocation3], 1 }
  0x43   :  { %205 = vsyncpa [#allocation4], 1 }

</bundles_post_ra>
